<compile_context>
chip_gen: v5e
topology: v5e:2x2
jax: 0.10.0
libtpu: 0.0.40
codegen_flags: <defaults>
</compile_context>

<pallas_src>
import jax
import jax.numpy as jnp
from jax.experimental import pallas as pl
from jax.experimental.pallas import tpu as pltpu

LANE = 128
SUBLANE = 8


def _round_up(n, m):
    return ((n + m - 1) // m) * m


def _pad2d(a, rows, cols):
    r, c = a.shape
    return jnp.pad(a, ((0, rows - r), (0, cols - c)))


def mlp_kernel(x_ref, w1_ref, w2_ref, w3_ref, b_ref, o_ref):
    # One batch tile per grid step; weights/bias are VMEM-resident.
    x = x_ref[...]
    h1 = jnp.dot(x, w1_ref[...], preferred_element_type=jnp.float32) + b_ref[0:1, :]
    h1 = jnp.maximum(h1, 0.0)
    h2 = jnp.dot(h1, w2_ref[...], preferred_element_type=jnp.float32) + b_ref[1:2, :]
    h2 = jnp.maximum(h2, 0.0)
    o_ref[...] = jnp.dot(h2, w3_ref[...], preferred_element_type=jnp.float32) + b_ref[2:3, :]


def mlp_forward(x, w1, b1, w2, b2, w3, b3):
    n, d_in = x.shape
    h1_dim, h2_dim = w1.shape[1], w2.shape[1]
    d_out = w3.shape[1]

    # Lane-dense padded widths (one shared padded width for h1/h2/out so the
    # stacked bias buffer and the three weight tiles share a layout).
    d_pad = _round_up(d_in, LANE)
    h_pad = _round_up(max(h1_dim, h2_dim, d_out), LANE)

    # Batch tile: multiple of 8 sublanes, large enough (up to 512 rows) to
    # amortize the ~0.35 us per-grid-step overhead when batch scales.
    tm = min(512, _round_up(n, SUBLANE))
    n_pad = _round_up(n, tm)

    # Host-side zero padding (pad rows/cols are exactly zero -> results for
    # the real columns are unchanged; ReLU keeps pad lanes at zero).
    xp = _pad2d(x, n_pad, d_pad)
    w1p = _pad2d(w1, d_pad, h_pad)
    w2p = _pad2d(w2, h_pad, h_pad)
    w3p = _pad2d(w3, h_pad, h_pad)

    # Stack the three biases into a single (8, h_pad) buffer -> one DMA
    # descriptor instead of three.
    b = jnp.zeros((SUBLANE, h_pad), jnp.float32)
    b = b.at[0, :h1_dim].set(b1.reshape(-1))
    b = b.at[1, :h2_dim].set(b2.reshape(-1))
    b = b.at[2, :d_out].set(b3.reshape(-1))

    grid = (n_pad // tm,)
    out_padded = pl.pallas_call(
        mlp_kernel,
        out_shape=jax.ShapeDtypeStruct((n_pad, h_pad), jnp.float32),
        grid=grid,
        in_specs=[
            pl.BlockSpec((tm, d_pad), lambda i: (i, 0)),      # x: tiled over batch
            pl.BlockSpec((d_pad, h_pad), lambda i: (0, 0)),   # w1: resident
            pl.BlockSpec((h_pad, h_pad), lambda i: (0, 0)),   # w2: resident
            pl.BlockSpec((h_pad, h_pad), lambda i: (0, 0)),   # w3: resident
            pl.BlockSpec((SUBLANE, h_pad), lambda i: (0, 0)), # stacked biases
        ],
        out_specs=pl.BlockSpec((tm, h_pad), lambda i: (i, 0)),
        compiler_params=pltpu.CompilerParams(
            dimension_semantics=("parallel",),
        ),
    )(xp, w1p, w2p, w3p, b)

    # Free layout plumbing: slice the real rows/columns back out.
    return out_padded[:n, :d_out]


def init_linear(key, fan_in, fan_out):
    # Deterministic init mimicking nn.Linear's U(-1/sqrt(fan_in), 1/sqrt(fan_in)).
    kw, kb = jax.random.split(key)
    bound = 1.0 / jnp.sqrt(fan_in)
    w = jax.random.uniform(kw, (fan_in, fan_out), jnp.float32, -bound, bound)
    b = jax.random.uniform(kb, (1, fan_out), jnp.float32, -bound, bound)
    return w, b


if __name__ == "__main__":
    input_dim = 7    # ['cylinders','displacement','horsepower','weight','acceleration','year','origin']
    output_dim = 1   # MPG regression target
    batch = 8

    key = jax.random.PRNGKey(0)
    kx, k1, k2, k3 = jax.random.split(key, 4)

    x = jax.random.normal(kx, (batch, input_dim), jnp.float32)
    w1, b1 = init_linear(k1, input_dim, 50)
    w2, b2 = init_linear(k2, 50, 25)
    w3, b3 = init_linear(k3, 25, output_dim)

    out = mlp_forward(x, w1, b1, w2, b2, w3, b3)
    jax.block_until_ready(out)

    # Pure-JAX reference check of the same forward pass (unpadded weights).
    ref = jnp.maximum(x @ w1 + b1, 0.0)
    ref = jnp.maximum(ref @ w2 + b2, 0.0)
    ref = ref @ w3 + b3
    assert out.shape == (batch, output_dim)
    assert jnp.allclose(out, ref, atol=1e-5, rtol=1e-5)

    print("KERNEL_OK")
</pallas_src>

<mosaic_0001>
module attributes {stable_mosaic.version = 11 : i64} {
  func.func @mlp_kernel(%arg0: i32, %arg1: memref<8x128xf32, #tpu.memory_space<vmem>>, %arg2: memref<128x128xf32, #tpu.memory_space<vmem>>, %arg3: memref<128x128xf32, #tpu.memory_space<vmem>>, %arg4: memref<128x128xf32, #tpu.memory_space<vmem>>, %arg5: memref<8x128xf32, #tpu.memory_space<vmem>>, %arg6: memref<8x128xf32, #tpu.memory_space<vmem>>) attributes {dimension_semantics = [#tpu.dimension_semantics<parallel>], iteration_bounds = array<i64: 1>, scalar_prefetch = 0 : i64, scratch_operands = 0 : i64, tpu.core_type = #tpu.core_type<tc>, window_params = [{transform_indices = @transform_0, window_bounds = array<i64: 8, 128>}, {pipeline_mode = #tpu.pipeline_mode<synchronous>, transform_indices = @transform_1, window_bounds = array<i64: 128, 128>}, {pipeline_mode = #tpu.pipeline_mode<synchronous>, transform_indices = @transform_2, window_bounds = array<i64: 128, 128>}, {pipeline_mode = #tpu.pipeline_mode<synchronous>, transform_indices = @transform_3, window_bounds = array<i64: 128, 128>}, {pipeline_mode = #tpu.pipeline_mode<synchronous>, transform_indices = @transform_4, window_bounds = array<i64: 8, 128>}, {transform_indices = @transform_5, window_bounds = array<i64: 8, 128>}]} {
    %c0 = arith.constant 0 : index
    %c0_0 = arith.constant 0 : index
    %0 = vector.load %arg1[%c0, %c0_0] : memref<8x128xf32, #tpu.memory_space<vmem>>, vector<8x128xf32>
    %c0_1 = arith.constant 0 : index
    %c0_2 = arith.constant 0 : index
    %1 = vector.load %arg2[%c0_1, %c0_2] : memref<128x128xf32, #tpu.memory_space<vmem>>, vector<128x128xf32>
    %cst = arith.constant dense<0.000000e+00> : vector<8x128xf32>
    %2 = tpu.matmul %0, %1, %cst {dimension_numbers = #tpu.dot_dimension_numbers<[1], [0], [0], [1], [0, 0, 1, 1], [], []>} : vector<8x128xf32>, vector<128x128xf32>, vector<8x128xf32> -> vector<8x128xf32>
    %c0_3 = arith.constant 0 : index
    %c0_4 = arith.constant 0 : index
    %3 = vector.load %arg5[%c0_3, %c0_4] : memref<8x128xf32, #tpu.memory_space<vmem>>, vector<1x128xf32>
    %4 = vector.broadcast %3 : vector<1x128xf32> to vector<8x128xf32>
    %5 = arith.addf %2, %4 : vector<8x128xf32>
    %cst_5 = arith.constant 0.000000e+00 : f32
    %6 = vector.broadcast %cst_5 : f32 to vector<8x128xf32>
    %7 = arith.maximumf %5, %6 : vector<8x128xf32>
    %c0_6 = arith.constant 0 : index
    %c0_7 = arith.constant 0 : index
    %8 = vector.load %arg3[%c0_6, %c0_7] : memref<128x128xf32, #tpu.memory_space<vmem>>, vector<128x128xf32>
    %cst_8 = arith.constant dense<0.000000e+00> : vector<8x128xf32>
    %9 = tpu.matmul %7, %8, %cst_8 {dimension_numbers = #tpu.dot_dimension_numbers<[1], [0], [0], [1], [0, 0, 1, 1], [], []>} : vector<8x128xf32>, vector<128x128xf32>, vector<8x128xf32> -> vector<8x128xf32>
    %c1 = arith.constant 1 : index
    %c0_9 = arith.constant 0 : index
    %10 = vector.load %arg5[%c1, %c0_9] : memref<8x128xf32, #tpu.memory_space<vmem>>, vector<1x128xf32>
    %11 = vector.broadcast %10 : vector<1x128xf32> to vector<8x128xf32>
    %12 = arith.addf %9, %11 : vector<8x128xf32>
    %cst_10 = arith.constant 0.000000e+00 : f32
    %13 = vector.broadcast %cst_10 : f32 to vector<8x128xf32>
    %14 = arith.maximumf %12, %13 : vector<8x128xf32>
    %c0_11 = arith.constant 0 : index
    %c0_12 = arith.constant 0 : index
    %15 = vector.load %arg4[%c0_11, %c0_12] : memref<128x128xf32, #tpu.memory_space<vmem>>, vector<128x128xf32>
    %cst_13 = arith.constant dense<0.000000e+00> : vector<8x128xf32>
    %16 = tpu.matmul %14, %15, %cst_13 {dimension_numbers = #tpu.dot_dimension_numbers<[1], [0], [0], [1], [0, 0, 1, 1], [], []>} : vector<8x128xf32>, vector<128x128xf32>, vector<8x128xf32> -> vector<8x128xf32>
    %c2 = arith.constant 2 : index
    %c0_14 = arith.constant 0 : index
    %17 = vector.load %arg5[%c2, %c0_14] : memref<8x128xf32, #tpu.memory_space<vmem>>, vector<1x128xf32>
    %18 = vector.broadcast %17 : vector<1x128xf32> to vector<8x128xf32>
    %19 = arith.addf %16, %18 : vector<8x128xf32>
    %c0_15 = arith.constant 0 : index
    %c0_16 = arith.constant 0 : index
    %20 = vector.load %arg6[%c0_15, %c0_16] : memref<8x128xf32, #tpu.memory_space<vmem>>, vector<8x128xf32>
    tpu.vector_store %arg6[%c0_15, %c0_16], %19 {strides = array<i32>} : memref<8x128xf32, #tpu.memory_space<vmem>>, vector<8x128xf32>,
    return
  }
  func.func @transform_0(%arg0: i32) -> (i32, i32) {
    %c0_i32 = arith.constant 0 : i32
    %c0_i32_0 = arith.constant 0 : i32
    return %arg0, %c0_i32 : i32, i32
  }
  func.func @transform_1(%arg0: i32) -> (i32, i32) {
    %c0_i32 = arith.constant 0 : i32
    %c0_i32_0 = arith.constant 0 : i32
    %c0_i32_1 = arith.constant 0 : i32
    return %c0_i32, %c0_i32_0 : i32, i32
  }
  func.func @transform_2(%arg0: i32) -> (i32, i32) {
    %c0_i32 = arith.constant 0 : i32
    %c0_i32_0 = arith.constant 0 : i32
    %c0_i32_1 = arith.constant 0 : i32
    return %c0_i32, %c0_i32_0 : i32, i32
  }
  func.func @transform_3(%arg0: i32) -> (i32, i32) {
    %c0_i32 = arith.constant 0 : i32
    %c0_i32_0 = arith.constant 0 : i32
    %c0_i32_1 = arith.constant 0 : i32
    return %c0_i32, %c0_i32_0 : i32, i32
  }
  func.func @transform_4(%arg0: i32) -> (i32, i32) {
    %c0_i32 = arith.constant 0 : i32
    %c0_i32_0 = arith.constant 0 : i32
    %c0_i32_1 = arith.constant 0 : i32
    return %c0_i32, %c0_i32_0 : i32, i32
  }
  func.func @transform_5(%arg0: i32) -> (i32, i32) {
    %c0_i32 = arith.constant 0 : i32
    %c0_i32_0 = arith.constant 0 : i32
    return %arg0, %c0_i32 : i32, i32
  }
}

</mosaic_0001>

<bundles_post_ra>
// kernel: tpu_custom_call.1
= control target key start
LH: loop header
LB: loop body
LE: loop exit
PB: predicated region body
PF: predicated region fallthrough
CT: control target
= control target key end

     0   :  { %10 = vsyncpa [#allocation3], 0  ;;  %s451_s0 = inlined_call_operand.hbm [shape: f32[8,128], index: 0, kind: input, shape index: {}]   ;;  %s452_s1 = inlined_call_operand.hbm [shape: f32[128,128], index: 1, kind: input, shape index: {}]   ;;  %s453_s2 = inlined_call_operand.hbm [shape: f32[128,128], index: 2, kind: input, shape index: {}]   ;;  %s454_s3 = inlined_call_operand.hbm [shape: f32[128,128], index: 3, kind: input, shape index: {}]   ;;  %s455_s4 = inlined_call_operand.hbm [shape: f32[8,128], index: 4, kind: input, shape index: {}]   ;;  %s456_s5 = inlined_call_operand.hbm [shape: f32[8,128], index: 5, kind: output, shape index: {}]  }
   0x1   :  { %11 = vsyncpa [#allocation6], 0 }
   0x2   :  { %12 = vsyncpa [#allocation9], 0  ;;  %s29_s20 = sshll.u32 %s452_s1, 4  ;;  %s30_s20 = int_to_ptr.hbm [resolvable:$true] %s29_s20 }
   0x3   :  { %13 = vsyncpa [#allocation4], 0  ;;  %s395_s21 = smov [#allocation5]   ;;  %s55_s25 = sshll.u32 %s454_s3, 4  ;;  %s56_s25 = int_to_ptr.hbm [resolvable:$true] %s55_s25 }
   0x4   :  { %s31_s22 = sshll.u32 %s395_s21, 4  ;;  %s396_s26 = smov 128   ;;  %s32_s22 = int_to_ptr.vmem [resolvable:$true] %s31_s22 }
   0x5   :  { %s397_s27 = smov 8   ;;  %s398_s28 = smov [#allocation8]  }
   0x6   :  { %37 = dma.hbm_to_vmem [thread:$0]  %s30_s20, 2048, %s32_s22, [#allocation6], %s396_s26, %s396_s26, %s397_s27  }
   0x7   :  { %s57_s29 = sshll.u32 %s398_s28, 4  ;;  %s19_s7 = sshll.u32 %s451_s0, 4  ;;  %s58_s29 = int_to_ptr.vmem [resolvable:$true] %s57_s29  ;;  %s20_s7 = int_to_ptr.hbm [resolvable:$true] %s19_s7 }
   0x8   :  { %63 = dma.hbm_to_vmem [thread:$0]  %s56_s25, 2048, %s58_s29, [#allocation9], %s396_s26, %s396_s26, %s397_s27  }
   0x9   :  { %s42_s9 = sshll.u32 %s453_s2, 4  ;;  %s399_s10 = smov [#allocation2]   ;;  %s43_s9 = int_to_ptr.hbm [resolvable:$true] %s42_s9 }
   0xa   :  { %s21_s11 = sshll.u32 %s399_s10, 4  ;;  %s400_s3 = smov [#allocation7]   ;;  %s22_s11 = int_to_ptr.vmem [resolvable:$true] %s21_s11 }
   0xb   :  { %24 = dma.hbm_to_vmem [thread:$0]  %s20_s7, 128, %s22_s11, [#allocation3]  }
   0xc   :  { %s44_s12 = sshll.u32 %s400_s3, 4  ;;  %s69_s15 = sshll.u32 %s455_s4, 4  ;;  %s45_s12 = int_to_ptr.vmem [resolvable:$true] %s44_s12  ;;  %s70_s15 = int_to_ptr.hbm [resolvable:$true] %s69_s15 }
   0xd   :  { %50 = dma.hbm_to_vmem [thread:$0]  %s43_s9, 2048, %s45_s12, [#allocation6], %s396_s26, %s396_s26, %s397_s27  }
   0xe   :  { %s401_s0 = smov [#allocation10]  }
   0xf   :  { %s71_s16 = sshll.u32 %s401_s0, 4  ;;  %s72_s16 = int_to_ptr.vmem [resolvable:$true] %s71_s16 }
  0x10   :  { %74 = dma.hbm_to_vmem [thread:$0]  %s70_s15, 128, %s72_s16, [#allocation9]  }
  0x11   :  { %387 = dma.done.wait [#allocation3], 128  }
  0x12   :  { %388 = vsyncadd [#allocation3], 4294967168 }
  0x13   :  { %389 = dma.done.wait [#allocation6], 4096  }
  0x14   :  { %390 = vsyncadd [#allocation6], 4294963200 }
  0x15   :  { %391 = dma.done.wait [#allocation9], 2176  }
  0x16   :  { %392 = vsyncadd [#allocation9], 4294965120  ;;  %v111_v0 = vld [vmem:[#allocation5 + $0x78] sm:$0xff]  ;;  %v110_v1 = vld [vmem:[#allocation5 + $0x70] sm:$0xff]  ;;  %s402_s2 = smov [#allocation11]   ;;  %s220_s19 = sshll.u32 %s456_s5, 4  ;;  %s221_s19 = int_to_ptr.hbm [resolvable:$true] %s220_s19 }
  0x17   :  { %114 = vmatpush.msra.mxu0 %v111_v0  ;;  %v109_v2 = vld [vmem:[#allocation5 + $0x68] sm:$0xff]  ;;  %v108_v3 = vld [vmem:[#allocation5 + $0x60] sm:$0xff]  ;;  %v150_v4 = vld [vmem:[#allocation7 + $0x78] sm:$0xff]  ;;  %s218_s4 = sshll.u32 %s402_s2, 4  ;;  %s219_s4 = int_to_ptr.vmem [resolvable:$true] %s218_s4 }
  0x18   :  { %v107_v5 = vld [vmem:[#allocation5 + $0x58] sm:$0xff]  ;;  %153 = vmatpush.msra.mxu1 %v150_v4  ;;  %v149_v6 = vld [vmem:[#allocation7 + $0x70] sm:$0xff]  ;;  %v148_v7 = vld [vmem:[#allocation7 + $0x68] sm:$0xff] }
  0x19   :  { %115 = vmatpush.msra.mxu0 %v110_v1  ;;  %v106_v8 = vld [vmem:[#allocation5 + $0x50] sm:$0xff]  ;;  %v147_v9 = vld [vmem:[#allocation7 + $0x60] sm:$0xff]  ;;  %v105_v10 = vld [vmem:[#allocation5 + $0x48] sm:$0xff] }
  0x1a   :  { %154 = vmatpush.msra.mxu1 %v149_v6  ;;  %v146_v11 = vld [vmem:[#allocation7 + $0x58] sm:$0xff]  ;;  %v104_v12 = vld [vmem:[#allocation5 + $0x40] sm:$0xff]  ;;  %v145_v13 = vld [vmem:[#allocation7 + $0x50] sm:$0xff] }
  0x1b   :  { %116 = vmatpush.msra.mxu0 %v109_v2  ;;  %v103_v14 = vld [vmem:[#allocation5 + $0x38] sm:$0xff]  ;;  %v144_v15 = vld [vmem:[#allocation7 + $0x48] sm:$0xff]  ;;  %v102_v16 = vld [vmem:[#allocation5 + $0x30] sm:$0xff] }
  0x1c   :  { %155 = vmatpush.msra.mxu1 %v148_v7  ;;  %v143_v17 = vld [vmem:[#allocation7 + $0x40] sm:$0xff]  ;;  %v101_v18 = vld [vmem:[#allocation5 + $0x28] sm:$0xff]  ;;  %v142_v19 = vld [vmem:[#allocation7 + $0x38] sm:$0xff] }
  0x1d   :  { %117 = vmatpush.msra.mxu0 %v108_v3  ;;  %v100_v20 = vld [vmem:[#allocation5 + $0x20] sm:$0xff]  ;;  %v141_v21 = vld [vmem:[#allocation7 + $0x30] sm:$0xff]  ;;  %v99_v22 = vld [vmem:[#allocation5 + $0x18] sm:$0xff] }
  0x1e   :  { %156 = vmatpush.msra.mxu1 %v147_v9  ;;  %v140_v23 = vld [vmem:[#allocation7 + $0x28] sm:$0xff]  ;;  %v98_v24 = vld [vmem:[#allocation5 + $0x10] sm:$0xff]  ;;  %v139_v25 = vld [vmem:[#allocation7 + $0x20] sm:$0xff] }
  0x1f   :  { %118 = vmatpush.msra.mxu0 %v107_v5  ;;  %v97_v26 = vld [vmem:[#allocation5 + $0x8] sm:$0xff]  ;;  %v138_v27 = vld [vmem:[#allocation7 + $0x18] sm:$0xff]  ;;  %v96_v28 = vld [vmem:[#allocation5] sm:$0xff] }
  0x20   :  { %157 = vmatpush.msra.mxu1 %v146_v11  ;;  %v95_v29 = vld [vmem:[#allocation2] sm:$0xff]  ;;  %v137_v30 = vld [vmem:[#allocation7 + $0x10] sm:$0xff]  ;;  %v136_v31 = vld [vmem:[#allocation7 + $0x8] sm:$0xff] }
  0x21   :  { %119 = vmatpush.msra.mxu0 %v106_v8  ;;  %v135_v32 = vld [vmem:[#allocation7] sm:$0xff]  ;;  %v189_v33 = vld [vmem:[#allocation8 + $0x78] sm:$0xff]  ;;  %v188_v34 = vld [vmem:[#allocation8 + $0x70] sm:$0xff] }
  0x22   :  { %158 = vmatpush.msra.mxu1 %v145_v13  ;;  %192 = vmatpush.msra.mxu2 %v189_v33  ;;  %v187_v35 = vld [vmem:[#allocation8 + $0x68] sm:$0xff]  ;;  %v186_v36 = vld [vmem:[#allocation8 + $0x60] sm:$0xff]  ;;  %v185_v37 = vld [vmem:[#allocation8 + $0x58] sm:$0xff] }
  0x23   :  { %120 = vmatpush.msra.mxu0 %v105_v10  ;;  %v184_v38 = vld [vmem:[#allocation8 + $0x50] sm:$0xff]  ;;  %v183_v39 = vld [vmem:[#allocation8 + $0x48] sm:$0xff]  ;;  %v182_v40 = vld [vmem:[#allocation8 + $0x40] sm:$0xff] }
  0x24   :  { %159 = vmatpush.msra.mxu1 %v144_v15  ;;  %193 = vmatpush.msra.mxu2 %v188_v34  ;;  %v181_v41 = vld [vmem:[#allocation8 + $0x38] sm:$0xff]  ;;  %v180_v42 = vld [vmem:[#allocation8 + $0x30] sm:$0xff]  ;;  %v179_v43 = vld [vmem:[#allocation8 + $0x28] sm:$0xff] }
  0x25   :  { %121 = vmatpush.msra.mxu0 %v104_v12  ;;  %v178_v44 = vld [vmem:[#allocation8 + $0x20] sm:$0xff]  ;;  %v177_v45 = vld [vmem:[#allocation8 + $0x18] sm:$0xff]  ;;  %v176_v50 = vld [vmem:[#allocation8 + $0x10] sm:$0xff] }
  0x26   :  { %160 = vmatpush.msra.mxu1 %v143_v17  ;;  %194 = vmatpush.msra.mxu2 %v187_v35  ;;  %v240_v46 = vld [vmem:[#allocation10] ss:$0 sm:$0xff]  ;;  %v175_v51 = vld [vmem:[#allocation8 + $0x8] sm:$0xff]  ;;  %v241_v53 = vld [vmem:[#allocation10 + $0x1] ss:$0 sm:$0xff] }
  0x27   :  { %122 = vmatpush.msra.mxu0 %v103_v14  ;;  %v174_v52 = vld [vmem:[#allocation8] sm:$0xff] }
  0x28   :  { %161 = vmatpush.msra.mxu1 %v142_v19  ;;  %195 = vmatpush.msra.mxu2 %v186_v36  ;;  %v242_v57 = vld [vmem:[#allocation10 + $0x2] ss:$0 sm:$0xff] }
  0x29   :  { %123 = vmatpush.msra.mxu0 %v102_v16 }
  0x2a   :  { %162 = vmatpush.msra.mxu1 %v141_v21  ;;  %196 = vmatpush.msra.mxu2 %v185_v37 }
  0x2b   :  { %124 = vmatpush.msra.mxu0 %v101_v18 }
  0x2c   :  { %163 = vmatpush.msra.mxu1 %v140_v23  ;;  %197 = vmatpush.msra.mxu2 %v184_v38 }
  0x2d   :  { %125 = vmatpush.msra.mxu0 %v100_v20 }
  0x2e   :  { %164 = vmatpush.msra.mxu1 %v139_v25  ;;  %198 = vmatpush.msra.mxu2 %v183_v39 }
  0x2f   :  { %126 = vmatpush.msra.mxu0 %v99_v22 }
  0x30   :  { %165 = vmatpush.msra.mxu1 %v138_v27  ;;  %199 = vmatpush.msra.mxu2 %v182_v40 }
  0x31   :  { %127 = vmatpush.msra.mxu0 %v98_v24 }
  0x32   :  { %166 = vmatpush.msra.mxu1 %v137_v30  ;;  %200 = vmatpush.msra.mxu2 %v181_v41 }
  0x33   :  { %128 = vmatpush.msra.mxu0 %v97_v26 }
  0x34   :  { %167 = vmatpush.msra.mxu1 %v136_v31  ;;  %201 = vmatpush.msra.mxu2 %v180_v42 }
  0x35   :  { %129 = vmatpush.msra.mxu0 %v96_v28 }
  0x36   :  { %130 = vmatmul.f32.vlgmr.msra.gmra.mxu0 %v95_v29  ;;  %168 = vmatpush.msra.mxu1 %v135_v32 }
  0x37   :  { %202 = vmatpush.msra.mxu2 %v179_v43 }
  0x39   :  { %203 = vmatpush.msra.mxu2 %v178_v44 }
  0x3b   :  { %204 = vmatpush.msra.mxu2 %v177_v45 }
  0x3d   :  { %205 = vmatpush.msra.mxu2 %v176_v50 }
  0x3f   :  { %206 = vmatpush.msra.mxu2 %v175_v51 }
  0x41   :  { %207 = vmatpush.msra.mxu2 %v174_v52 }
  0xb3   :  { %v131_v47 = vpop.f32.mrf.mxu0 }
  0xb4   :  { %v132_v48 = vadd.f32 %v240_v46, %v131_v47 }
  0xb6   :  { %v134_v49 = vmax.f32 %v132_v48, 0.0 }
  0xb8   :  { %169 = vmatmul.f32.vlgmr.msra.gmra.mxu1 %v134_v49 }
 0x135   :  { %v170_v54 = vpop.f32.mrf.mxu1 }
 0x136   :  { %v171_v55 = vadd.f32 %v241_v53, %v170_v54 }
 0x138   :  { %v173_v56 = vmax.f32 %v171_v55, 0.0 }
 0x13a   :  { %208 = vmatmul.f32.vlgmr.msra.gmra.mxu2 %v173_v56 }
 0x1bd   :  { %v209_v58 = vpop.f32.mrf.mxu2 }
 0x1be   :  { %v210_v59 = vadd.f32 %v242_v57, %v209_v58 }
 0x1c0   :  { %212 = vst [vmem:[#allocation11] sm:$0xff] %v210_v59 }
 0x1c1   :  { %223 = dma.vmem_to_hbm [thread:$0]  %s219_s4, 128, %s221_s19, [#allocation4]  }
 0x1c2   :  { %393 = dma.done.wait [#allocation4], 128  }
 0x1c3   :  { %394 = vsyncadd [#allocation4], 4294967168 }
 0x1c4   :  { %228 = vsyncpa [#allocation3], 1 }
 0x1c5   :  { %229 = vsyncpa [#allocation6], 1 }
 0x1c6   :  { %230 = vsyncpa [#allocation9], 1 }
 0x1c7   :  { %231 = vsyncpa [#allocation4], 1 }

</bundles_post_ra>
